<compile_context>
chip_gen: v6e
topology: v6e:2x2x1
jax: 0.10.0
libtpu: 0.0.40
codegen_flags: <defaults>
</compile_context>

<pallas_src>
import functools

import jax
import jax.numpy as jnp
from jax import lax
from jax.experimental import pallas as pl
from jax.experimental.pallas import tpu as pltpu


def _supcon_kernel(anchor_ref, contrast_ref, rlab_ref, clab_ref, cnt_ref, out_ref,
                   *, temperature, base_temperature, block_rows):
    i = pl.program_id(0)

    inv_t = jnp.float32(1.0 / temperature)
    a = anchor_ref[...].astype(jnp.float32) * inv_t         # [TM, D]  fold 1/T into LHS
    b = contrast_ref[...].astype(jnp.float32)               # [N,  D]  resident

    # sim = (A / T) @ B.T without materializing a transpose (contract dim 1 of both).
    sim = lax.dot_general(a, b, (((1,), (1,)), ((), ())),
                          preferred_element_type=jnp.float32)        # [TM, N]

    tm, n = sim.shape
    row_ids = i * block_rows + lax.broadcasted_iota(jnp.int32, (tm, n), 0)
    col_ids = lax.broadcasted_iota(jnp.int32, (tm, n), 1)
    not_diag = row_ids != col_ids                                     # logits_mask

    # Positive mask rebuilt in-kernel from labels (no [N,N] mask DMA); diagonal zeroed.
    same_lab = rlab_ref[...] == clab_ref[...]                         # [TM,1]==[1,N] -> [TM,N]
    pos_mask = jnp.where(jnp.logical_and(same_lab, not_diag),
                         1.0, 0.0).astype(jnp.float32)                # [TM, N]

    # Numerically-stabilized log-softmax over the full row (row max includes the
    # self-similarity diagonal, exactly as in the PyTorch reference).
    row_max = jnp.max(sim, axis=-1, keepdims=True)                    # [TM, 1]
    logits = sim - row_max                                            # [TM, N]

    exp_logits = jnp.where(not_diag, jnp.exp(logits), 0.0)            # [TM, N]
    denom = jnp.sum(exp_logits, axis=-1, keepdims=True)               # [TM, 1]

    # mean_log_prob_pos = sum(pos * (logits - log denom)) / cnt
    #                   = (sum(pos*logits) - cnt*log(denom)) / cnt   (no [TM,N] log_prob temp)
    pos_sum = jnp.sum(pos_mask * logits, axis=-1, keepdims=True)      # [TM, 1]
    pos_cnt = cnt_ref[...]                                            # [TM, 1] (precomputed)
    # NOTE: rows with zero positives divide by zero -> NaN, mirroring PyTorch behavior.
    mean_log_prob_pos = (pos_sum - pos_cnt * jnp.log(denom)) / pos_cnt

    loss_rows = (-(temperature / base_temperature)) * mean_log_prob_pos   # [TM, 1]
    out_ref[...] = jnp.broadcast_to(loss_rows, out_ref.shape)             # lane-dense write


def _pick_block_rows(n):
    # Keep the [TM, N] slab + temporaries comfortably inside scoped VMEM,
    # including on v7x (64 MiB physical / 32 MiB scoped default).
    for cand in (256, 128, 64, 32, 16, 8):
        if n % cand == 0:
            return cand
    return n  # single block fallback for odd small N


def supcon_loss(features, labels=None, mask=None,
                temperature=0.07, base_temperature=0.07):
    """features: [bsz, n_views, dim]; labels: [bsz] int or None; mask: [bsz,bsz] or None."""
    if features.ndim < 3:
        raise ValueError("`features` needs to be [bsz, n_views, ...]")
    if features.ndim > 3:
        features = features.reshape(features.shape[0], features.shape[1], -1)
    bsz, n_views, dim = features.shape

    if labels is not None and mask is not None:
        raise ValueError("Cannot define both `labels` and `mask`")
    if mask is not None:
        # TODO(synk): arbitrary / asymmetric `mask` cannot be expressed as a label
        # compare, so this rarely-used path falls back to the pure-JAX reference math.
        return _supcon_loss_ref(features, mask=mask,
                                temperature=temperature, base_temperature=base_temperature)

    if labels is None:
        label_vec = jnp.arange(bsz, dtype=jnp.int32)     # identity mask == SimCLR case
    else:
        label_vec = jnp.asarray(labels).reshape(-1).astype(jnp.int32)
        if label_vec.shape[0] != bsz:
            raise ValueError("Num of labels does not match num of features")

    N = bsz * n_views
    # contrast_feature = cat(unbind(features, dim=1), dim=0); row r is sample (r % bsz)
    contrast_feature = jnp.transpose(features, (1, 0, 2)).reshape(N, dim).astype(jnp.float32)

    row_labels = jnp.tile(label_vec, n_views)                                    # [N]
    # positives per anchor row (diagonal excluded): n_views * (#same-label samples) - 1
    same_counts = jnp.sum(label_vec[:, None] == label_vec[None, :], axis=1)      # [bsz]
    pos_cnt = jnp.tile(n_views * same_counts - 1, n_views).astype(jnp.float32)   # [N]

    block_rows = _pick_block_rows(N)
    grid = (N // block_rows,)

    kernel = functools.partial(
        _supcon_kernel,
        temperature=float(temperature),
        base_temperature=float(base_temperature),
        block_rows=block_rows,
    )

    per_row = pl.pallas_call(
        kernel,
        out_shape=jax.ShapeDtypeStruct((N, 128), jnp.float32),
        grid_spec=pltpu.PrefetchScalarGridSpec(
            num_scalar_prefetch=0,
            grid=grid,
            in_specs=[
                pl.BlockSpec((block_rows, dim), lambda i: (i, 0)),   # anchor row tile (streams)
                pl.BlockSpec((N, dim), lambda i: (0, 0)),            # full contrast feats (resident)
                pl.BlockSpec((block_rows, 1), lambda i: (i, 0)),     # row labels for this tile
                pl.BlockSpec((1, N), lambda i: (0, 0)),              # column labels (resident)
                pl.BlockSpec((block_rows, 1), lambda i: (i, 0)),     # positive counts per row
            ],
            out_specs=pl.BlockSpec((block_rows, 128), lambda i: (i, 0)),
        ),
        compiler_params=pltpu.CompilerParams(
            dimension_semantics=("parallel",),          # shard row tiles across TCs (v7x)
            vmem_limit_bytes=32 * 1024 * 1024,          # above v5e's 16 MiB scoped default
        ),
    )(
        contrast_feature,
        contrast_feature,
        row_labels.reshape(N, 1),
        row_labels.reshape(1, N),
        pos_cnt.reshape(N, 1),
    )
    # loss.view(anchor_count, batch_size).mean() == mean over all N anchor rows
    return jnp.mean(per_row[:, 0])


def _supcon_loss_ref(features, labels=None, mask=None,
                     temperature=0.07, base_temperature=0.07):
    """Pure-JAX reference mirroring the PyTorch code (contrast_mode='all')."""
    feats = features.reshape(features.shape[0], features.shape[1], -1).astype(jnp.float32)
    bsz, n_views = feats.shape[0], feats.shape[1]
    if labels is None and mask is None:
        base_mask = jnp.eye(bsz, dtype=jnp.float32)
    elif labels is not None:
        lab = jnp.asarray(labels).reshape(-1, 1)
        base_mask = (lab == lab.T).astype(jnp.float32)
    else:
        base_mask = mask.astype(jnp.float32)
    cf = jnp.transpose(feats, (1, 0, 2)).reshape(n_views * bsz, -1)
    adc = jnp.matmul(cf, cf.T) / temperature
    logits = adc - jnp.max(adc, axis=1, keepdims=True)
    m = jnp.tile(base_mask, (n_views, n_views))
    N = bsz * n_views
    logits_mask = 1.0 - jnp.eye(N, dtype=jnp.float32)
    m = m * logits_mask
    exp_logits = jnp.exp(logits) * logits_mask
    log_prob = logits - jnp.log(exp_logits.sum(1, keepdims=True))
    mean_log_prob_pos = (m * log_prob).sum(1) / m.sum(1)
    loss = -(temperature / base_temperature) * mean_log_prob_pos
    return loss.reshape(n_views, bsz).mean()


if __name__ == "__main__":
    key = jax.random.PRNGKey(0)
    k1, k2, k3, k4 = jax.random.split(key, 4)

    # Small demo: bsz=8, n_views=2, dim=32  (N = 16)
    bsz, n_views, dim = 8, 2, 32
    feats = jax.random.normal(k1, (bsz, n_views, dim), dtype=jnp.float32)
    feats = feats / jnp.linalg.norm(feats, axis=-1, keepdims=True)   # typical usage
    labels = jax.random.randint(k2, (bsz,), 0, 2, dtype=jnp.int32)

    loss = jax.block_until_ready(supcon_loss(feats, labels=labels))
    ref = _supcon_loss_ref(feats, labels=labels)
    assert jnp.allclose(loss, ref, rtol=1e-4, atol=1e-4), (loss, ref)

    # SimCLR (labels=None) path
    loss_u = jax.block_until_ready(supcon_loss(feats))
    ref_u = _supcon_loss_ref(feats)
    assert jnp.allclose(loss_u, ref_u, rtol=1e-4, atol=1e-4), (loss_u, ref_u)

    # Larger case exercising multiple row tiles (N = 512, TM = 256, grid = (2,))
    bsz2, n_views2, dim2 = 256, 2, 32
    feats2 = jax.random.normal(k3, (bsz2, n_views2, dim2), dtype=jnp.float32)
    feats2 = feats2 / jnp.linalg.norm(feats2, axis=-1, keepdims=True)
    labels2 = jax.random.randint(k4, (bsz2,), 0, 10, dtype=jnp.int32)
    loss2 = jax.block_until_ready(supcon_loss(feats2, labels=labels2))
    ref2 = _supcon_loss_ref(feats2, labels=labels2)
    assert jnp.allclose(loss2, ref2, rtol=1e-4, atol=1e-4), (loss2, ref2)

    print("KERNEL_OK")
</pallas_src>

<mosaic_0001>
module attributes {stable_mosaic.version = 11 : i64} {
  func.func @_supcon_kernel(%arg0: i32, %arg1: memref<16x32xf32, #tpu.memory_space<vmem>>, %arg2: memref<16x32xf32, #tpu.memory_space<vmem>>, %arg3: memref<16x1xi32, #tpu.memory_space<vmem>>, %arg4: memref<1x16xi32, #tpu.memory_space<vmem>>, %arg5: memref<16x1xf32, #tpu.memory_space<vmem>>, %arg6: memref<16x128xf32, #tpu.memory_space<vmem>>) attributes {dimension_semantics = [#tpu.dimension_semantics<parallel>], iteration_bounds = array<i64: 1>, scalar_prefetch = 0 : i64, scratch_operands = 0 : i64, tpu.core_type = #tpu.core_type<tc>, window_params = [{transform_indices = @transform_0, window_bounds = array<i64: 16, 32>}, {pipeline_mode = #tpu.pipeline_mode<synchronous>, transform_indices = @transform_1, window_bounds = array<i64: 16, 32>}, {transform_indices = @transform_2, window_bounds = array<i64: 16, 1>}, {pipeline_mode = #tpu.pipeline_mode<synchronous>, transform_indices = @transform_3, window_bounds = array<i64: 1, 16>}, {transform_indices = @transform_4, window_bounds = array<i64: 16, 1>}, {transform_indices = @transform_5, window_bounds = array<i64: 16, 128>}]} {
    %c0 = arith.constant 0 : index
    %c0_0 = arith.constant 0 : index
    %0 = vector.load %arg1[%c0, %c0_0] : memref<16x32xf32, #tpu.memory_space<vmem>>, vector<16x32xf32>
    %cst = arith.constant 14.2857141 : f32
    %1 = vector.broadcast %cst : f32 to vector<16x32xf32>
    %2 = arith.mulf %0, %1 : vector<16x32xf32>
    %c0_1 = arith.constant 0 : index
    %c0_2 = arith.constant 0 : index
    %3 = vector.load %arg2[%c0_1, %c0_2] : memref<16x32xf32, #tpu.memory_space<vmem>>, vector<16x32xf32>
    %cst_3 = arith.constant dense<0.000000e+00> : vector<16x16xf32>
    %4 = tpu.matmul %2, %3, %cst_3 {dimension_numbers = #tpu.dot_dimension_numbers<[1], [1], [0], [0], [0, 0, 1, 0], [], []>} : vector<16x32xf32>, vector<16x32xf32>, vector<16x16xf32> -> vector<16x16xf32>
    %c16_i32 = arith.constant 16 : i32
    %5 = arith.muli %arg0, %c16_i32 : i32
    %6 = tpu.iota {dimensions = array<i32: 0>} : vector<16x16xi32>
    %7 = vector.broadcast %5 : i32 to vector<16x16xi32>
    %8 = arith.addi %7, %6 : vector<16x16xi32>
    %9 = tpu.iota {dimensions = array<i32: 1>} : vector<16x16xi32>
    %10 = arith.cmpi ne, %8, %9 : vector<16x16xi32>
    %c0_4 = arith.constant 0 : index
    %c0_5 = arith.constant 0 : index
    %11 = vector.load %arg3[%c0_4, %c0_5] : memref<16x1xi32, #tpu.memory_space<vmem>>, vector<16x1xi32>
    %c0_6 = arith.constant 0 : index
    %c0_7 = arith.constant 0 : index
    %12 = vector.load %arg4[%c0_6, %c0_7] : memref<1x16xi32, #tpu.memory_space<vmem>>, vector<1x16xi32>
    %13 = vector.broadcast %11 : vector<16x1xi32> to vector<16x16xi32>
    %14 = vector.broadcast %12 : vector<1x16xi32> to vector<16x16xi32>
    %15 = arith.cmpi eq, %13, %14 : vector<16x16xi32>
    %16 = arith.andi %15, %10 : vector<16x16xi1>
    %cst_8 = arith.constant 1.000000e+00 : f32
    %cst_9 = arith.constant 0.000000e+00 : f32
    %17 = vector.broadcast %cst_8 : f32 to vector<16x16xf32>
    %18 = vector.broadcast %cst_9 : f32 to vector<16x16xf32>
    %19 = arith.select %16, %17, %18 : vector<16x16xi1>, vector<16x16xf32>
    %cst_10 = arith.constant dense<0xFF800000> : vector<16xf32>
    %20 = vector.multi_reduction <maximumf>, %4, %cst_10 [1] : vector<16x16xf32> to vector<16xf32>
    %21 = vector.shape_cast %20 : vector<16xf32> to vector<16x1xf32>
    %22 = vector.broadcast %21 : vector<16x1xf32> to vector<16x16xf32>
    %23 = arith.subf %4, %22 : vector<16x16xf32>
    %24 = math.exp %23 : vector<16x16xf32>
    %cst_11 = arith.constant 0.000000e+00 : f32
    %25 = vector.broadcast %cst_11 : f32 to vector<16x16xf32>
    %26 = arith.select %10, %24, %25 : vector<16x16xi1>, vector<16x16xf32>
    %cst_12 = arith.constant dense<0.000000e+00> : vector<16xf32>
    %27 = vector.multi_reduction <add>, %26, %cst_12 [1] : vector<16x16xf32> to vector<16xf32>
    %28 = vector.shape_cast %27 : vector<16xf32> to vector<16x1xf32>
    %29 = arith.mulf %19, %23 : vector<16x16xf32>
    %cst_13 = arith.constant dense<0.000000e+00> : vector<16xf32>
    %30 = vector.multi_reduction <add>, %29, %cst_13 [1] : vector<16x16xf32> to vector<16xf32>
    %31 = vector.shape_cast %30 : vector<16xf32> to vector<16x1xf32>
    %c0_14 = arith.constant 0 : index
    %c0_15 = arith.constant 0 : index
    %32 = vector.load %arg5[%c0_14, %c0_15] : memref<16x1xf32, #tpu.memory_space<vmem>>, vector<16x1xf32>
    %33 = math.log %28 : vector<16x1xf32>
    %34 = arith.mulf %32, %33 : vector<16x1xf32>
    %35 = arith.subf %31, %34 : vector<16x1xf32>
    %36 = arith.divf %35, %32 : vector<16x1xf32>
    %cst_16 = arith.constant -1.000000e+00 : f32
    %37 = vector.broadcast %cst_16 : f32 to vector<16x1xf32>
    %38 = arith.mulf %37, %36 : vector<16x1xf32>
    %39 = vector.shape_cast %38 : vector<16x1xf32> to vector<16x1xf32>
    %40 = vector.broadcast %39 : vector<16x1xf32> to vector<16x128xf32>
    %c0_17 = arith.constant 0 : index
    %c0_18 = arith.constant 0 : index
    %41 = vector.load %arg6[%c0_17, %c0_18] : memref<16x128xf32, #tpu.memory_space<vmem>>, vector<16x128xf32>
    tpu.vector_store %arg6[%c0_17, %c0_18], %40 {strides = array<i32>} : memref<16x128xf32, #tpu.memory_space<vmem>>, vector<16x128xf32>,
    return
  }
  func.func @transform_0(%arg0: i32) -> (i32, i32) {
    %c0_i32 = arith.constant 0 : i32
    %c0_i32_0 = arith.constant 0 : i32
    return %arg0, %c0_i32 : i32, i32
  }
  func.func @transform_1(%arg0: i32) -> (i32, i32) {
    %c0_i32 = arith.constant 0 : i32
    %c0_i32_0 = arith.constant 0 : i32
    %c0_i32_1 = arith.constant 0 : i32
    return %c0_i32, %c0_i32_0 : i32, i32
  }
  func.func @transform_2(%arg0: i32) -> (i32, i32) {
    %c0_i32 = arith.constant 0 : i32
    %c0_i32_0 = arith.constant 0 : i32
    return %arg0, %c0_i32 : i32, i32
  }
  func.func @transform_3(%arg0: i32) -> (i32, i32) {
    %c0_i32 = arith.constant 0 : i32
    %c0_i32_0 = arith.constant 0 : i32
    %c0_i32_1 = arith.constant 0 : i32
    return %c0_i32, %c0_i32_0 : i32, i32
  }
  func.func @transform_4(%arg0: i32) -> (i32, i32) {
    %c0_i32 = arith.constant 0 : i32
    %c0_i32_0 = arith.constant 0 : i32
    return %arg0, %c0_i32 : i32, i32
  }
  func.func @transform_5(%arg0: i32) -> (i32, i32) {
    %c0_i32 = arith.constant 0 : i32
    %c0_i32_0 = arith.constant 0 : i32
    return %arg0, %c0_i32 : i32, i32
  }
}

</mosaic_0001>

<bundles_post_ra>
// kernel: tpu_custom_call.1
= control target key start
LH: loop header
LB: loop body
LE: loop exit
PB: predicated region body
PF: predicated region fallthrough
CT: control target
= control target key end

     0   :  { %vm27_vm0 = vcmask 261120   ;;  %s346_s0 = inlined_call_operand.vmem [shape: f32[16,32], index: 0, kind: input, shape index: {}]   ;;  %s347_s1 = inlined_call_operand.vmem [shape: f32[16,32], index: 1, kind: input, shape index: {}]   ;;  %s348_s2 = inlined_call_operand.vmem [shape: s32[16,1], index: 2, kind: input, shape index: {}]   ;;  %s349_s3 = inlined_call_operand.vmem [shape: s32[1,16], index: 3, kind: input, shape index: {}]   ;;  %s350_s4 = inlined_call_operand.vmem [shape: f32[16,1], index: 4, kind: input, shape index: {}]   ;;  %s351_s5 = inlined_call_operand.hbm [shape: f32[16,128], index: 5, kind: output, shape index: {}]  }
   0x1   :  { %v26_v0 = vld [vmem:[%s347_s1 + $0x8] sm:$0xff]  ;;  %v25_v1 = vld [vmem:[%s347_s1] sm:$0xff] }
   0x2   :  { %v21_v2 = vld [vmem:[%s346_s0] sm:$0xff]  ;;  %227 = vmatprep.subr.msk.mxu0 %vm27_vm0, %v26_v0 }
   0x3   :  { %v23_v3 = vmul.f32 14.285714, %v21_v2 }
   0x4   :  { %10 = vsyncpa [#allocation3], 0  ;;  %228 = vmatpush3.xpose.msk.msra.mxu0 %vm27_vm0, %v26_v0  ;;  %v22_v4 = vld [vmem:[%s346_s0 + $0x8] sm:$0xff]  ;;  %v126_v6 = vld [vmem:[%s348_s2] sm:$0xff]  ;;  %v275_v7 = vmov 0   ;;  %vm145_vm1 = vcmask 130048   ;;  %v116_v15 = vlaneseq }
   0x5   :  { %229 = vmatprep.subr.msk.mxu0 %vm27_vm0, %v25_v1  ;;  %231 = vmatprep.mubr.msk.f32.mxu0 %vm27_vm0, %v23_v3  ;;  %v24_v5 = vmul.f32 14.285714, %v22_v4  ;;  %v127_v8 = vld [vmem:[%s348_s2 + $0x8] sm:$0xff]  ;;  %v222_v23 = vld [vmem:[%s349_s3] ss:$0 sm:$0xff]  ;;  %v276_v26 = vmov 0.0  }
   0x6   :  { %239 = vset.pattern.permute.xlu1 %v275_v7  ;;  %240 = vset.pattern.permute.xlu0 %v275_v7  ;;  %v117_v20 = vshrl.u32 %v116_v15, 7  ;;  %v123_v21 = vand.u32 127, %v116_v15  ;;  %v174_v40 = vld [vmem:[%s350_s4] sm:$0xff]  ;;  %v175_v42 = vld [vmem:[%s350_s4 + $0x8] sm:$0xff]  ;;  %s277_s4 = smov [#allocation2]  }
   0x7   :  { %130 = vperm.xlu1 %239, %v126_v6   ;;  %s207_s7 = sshll.u32 %s277_s4, 4  ;;  %s208_s7 = int_to_ptr.vmem [resolvable:$true] %s207_s7 }
   0x8   :  { %230 = vmatpush3.xpose.msk.msra.mxu0 %vm27_vm0, %v25_v1  ;;  %vm124_vm2 = vcmp.ne.s32.totalorder %v117_v20, %v123_v21  ;;  %v118_v24 = vadd.s32 8, %v117_v20  ;;  %s253_s8 = scalar_lea.vmem %s208_s7, 256  ;;  %p258_p1 = scmp.lt.s32.totalorder %s208_s7, %s208_s7 }
   0x9   :  { %p254_p0 = scmp.ne.s32.totalorder %s208_s7, %s253_s8  ;;  %p259_p2 = scmp.lt.s32.totalorder %s253_s8, %s253_s8 }
   0xa   :  { %vm125_vm5 = vcmp.ne.s32.totalorder %v118_v24, %v123_v21 }
   0xb   :  { %232 = vmatmul.mubr.msk.f32.vlgmr.msra.gmra.mxu0 %vm27_vm0, %v24_v5  ;;  %133 = vperm.xlu1 %239, %v127_v8   ;;  %p260_p3 = por %p259_p2, %p258_p1 }
   0xd   :  { %p261_p4 = pnand %p260_p3, %p254_p0 }
  0x82   :  { %v131_v19 = vpop.permute.xlu1 %130 }
  0x83   :  { %vm139_vm3 = vcmp.eq.s32.totalorder %v131_v19, %v222_v23 }
  0x84   :  { %vm141_vm4 = vmand %vm139_vm3, %vm124_vm2 }
  0x85   :  { %v143_v27 = vsel %vm141_vm4, 1.0, %v276_v26 }
  0x86   :  { %v134_v25 = vpop.permute.xlu1 %133 }
  0x87   :  { %vm140_vm6 = vcmp.eq.s32.totalorder %v134_v25, %v222_v23 }
  0x88   :  { %vm142_vm7 = vmand %vm140_vm6, %vm125_vm5 }
  0x89   :  { %v144_v32 = vsel %vm142_vm7, 1.0, %v276_v26 }
  0xcb   :  { %v233_v9 = vpop.f32.mrf.mxu0 }
  0xcc   :  { %v149_v12 = vsel %vm145_vm1, %v233_v9, -inf }
  0xcd   :  { %v106_v10 = vpop.f32.mrf.mxu0 }
  0xce   :  { %v146_v11 = vsel %vm145_vm1, %v106_v10, -inf }
  0xcf   :  { %147 = vmax.xlane.f32.xlu0 %v146_v11 }
  0xd3   :  { %150 = vmax.xlane.f32.xlu0 %v149_v12 }
 0x158   :  { %v148_v13 = vpop.xlane.xlu0 %147 }
 0x159   :  { %v152_v14 = vsub.f32 %v106_v10, %v148_v13 }
 0x15b   :  { %v154_v16 = vmul.f32 1.442695, %v152_v14  ;;  %v166_v31 = vmul.f32 %v152_v14, %v143_v27 }
 0x15c   :  { %v151_v17 = vpop.xlane.xlu0 %150 }
 0x15d   :  { %241 = vpow2.f32 %v154_v16  ;;  %v153_v18 = vsub.f32 %v233_v9, %v151_v17  ;;  %v168_v35 = vsel %vm145_vm1, %v166_v31, 0.0 }
 0x15f   :  { %v156_v22 = vmul.f32 1.442695, %v153_v18  ;;  %v167_v37 = vmul.f32 %v153_v18, %v144_v32 }
 0x161   :  { %243 = vpow2.f32 %v156_v22  ;;  %v171_v38 = vsel %vm145_vm1, %v167_v37, 0.0 }
 0x16a   :  { %v242_v28 = vpop.eup %241 }
 0x16b   :  { %v158_v29 = vsel %vm124_vm2, %v242_v28, 0.0 }
 0x16c   :  { %v160_v30 = vsel %vm145_vm1, %v158_v29, 0.0 }
 0x16d   :  { %161 = vadd.xlane.f32.xlu0 %v160_v30 }
 0x16e   :  { %v244_v33 = vpop.eup %243 }
 0x16f   :  { %v159_v34 = vsel %vm125_vm5, %v244_v33, 0.0 }
 0x170   :  { %v163_v36 = vsel %vm145_vm1, %v159_v34, 0.0 }
 0x171   :  { %169 = vadd.xlane.f32.xlu0 %v168_v35  ;;  %164 = vadd.xlane.f32.xlu1 %v163_v36 }
 0x175   :  { %172 = vadd.xlane.f32.xlu0 %v171_v38 }
 0x1f6   :  { %v162_v39 = vpop.xlane.xlu0 %161 }
 0x1f7   :  { %245 = vlog2.f32 %v162_v39 }
 0x1f8   :  { %247 = vrcp.f32 %v174_v40 }
 0x1fa   :  { %v165_v41 = vpop.xlane.xlu1 %164  ;;  %v170_v45 = vpop.xlane.xlu0 %169 }
 0x1fb   :  { %249 = vlog2.f32 %v165_v41 }
 0x1fc   :  { %251 = vrcp.f32 %v175_v42 }
 0x1fe   :  { %v173_v54 = vpop.xlane.xlu0 %172 }
 0x204   :  { %v246_v43 = vpop.eup %245 }
 0x205   :  { %v177_v44 = vmul.f32 0.6931472, %v246_v43  ;;  %v248_v46 = vpop.eup %247 }
 0x207   :  { %v180_v47 = vmul.f32 %v177_v44, %v174_v40 }
 0x208   :  { %v250_v48 = vpop.eup %249 }
 0x209   :  { %v179_v49 = vmul.f32 0.6931472, %v250_v48  ;;  %v182_v50 = vsub.f32 %v170_v45, %v180_v47  ;;  %v252_v53 = vpop.eup %251 }
 0x20b   :  { %v185_v51 = vmul.f32 %v248_v46, %v182_v50  ;;  %v181_v52 = vmul.f32 %v179_v49, %v175_v42 }
 0x20d   :  { %v188_v55 = vmul.f32 -1.0, %v185_v51  ;;  %v183_v56 = vsub.f32 %v173_v54, %v181_v52 }
 0x20f   :  { %v187_v57 = vmul.f32 %v252_v53, %v183_v56  ;;  %192 = vperm.xlu0 %240, %v188_v55  }
 0x211   :  { %v189_v58 = vmul.f32 -1.0, %v187_v57 }
 0x213   :  { %197 = vperm.xlu1 %239, %v189_v58  }
 0x28a   :  { %v193_v59 = vpop.permute.xlu0 %192 }
 0x28b   :  { %200 = vst [vmem:[#allocation2] sm:$0xff] %v193_v59 }
 0x28e   :  { %v198_v60 = vpop.permute.xlu1 %197 }
 0x28f   :  { %201 = vst [vmem:[#allocation2 + $0x8] sm:$0xff] %v198_v60 }
 0x290   :  { %264 = shalt.err (!%p261_p4)
}
 0x291   :  { %s278_s9 = smov 128   ;;  %s279_s10 = smov 8  }
 0x292   :  { %213 = dma.vmem_to_hbm [thread:$0]  %s208_s7, 256, %s351_s5, [#allocation3], %s278_s9, %s278_s9, %s279_s10  }
 0x293   :  { %273 = dma.done.wait [#allocation3], 256  }
 0x294   :  { %274 = vsyncadd [#allocation3], 4294967040 }
 0x295   :  { %217 = vsyncpa [#allocation3], 1 }

</bundles_post_ra>
